<compile_context>
chip_gen: v6e
topology: v6e:2x2x1
jax: 0.10.0
libtpu: 0.0.40
codegen_flags: <defaults>
</compile_context>

<pallas_src>
import functools

import jax
import jax.numpy as jnp
from jax.experimental import pallas as pl
from jax.experimental.pallas import tpu as pltpu


_VMEM_LIMIT = 32 * 1024 * 1024  # safe scoped-VMEM limit on v5e/v6e/v7x


def _tile(dim, target):
    """Return `target` if it evenly divides `dim`, else the full extent."""
    return target if dim % target == 0 else dim


# ---------------------------------------------------------------------------
# Kernel A: tiled QKV projection  (B*N, D) @ (D, 3*inner) -> bf16 (B*N, 3*inner)
# ---------------------------------------------------------------------------
def _qkv_matmul_kernel(x_ref, w_ref, o_ref, acc_ref):
    @pl.when(pl.program_id(2) == 0)
    def _():
        acc_ref[...] = jnp.zeros_like(acc_ref)

    acc_ref[...] += jnp.dot(x_ref[...], w_ref[...],
                            preferred_element_type=jnp.float32)

    @pl.when(pl.program_id(2) == pl.num_programs(2) - 1)
    def _():
        o_ref[...] = acc_ref[...].astype(o_ref.dtype)


# ---------------------------------------------------------------------------
# Kernel B: flash attention (online softmax over kv tiles) + fused out-proj.
#   grid = (B, q_tiles, kv_tiles)
#   q/k/v blocks are lane-dense (1, tile, inner) slices of the qkv array
#   (the Q/K/V thirds are selected purely by the last-dim block index).
# ---------------------------------------------------------------------------
def _flash_attention_kernel(q_ref, k_ref, v_ref, wo_ref, bo_ref, o_ref,
                            m_scr, l_scr, acc_scr, *, heads, dim_head):
    kv_idx = pl.program_id(2)

    @pl.when(kv_idx == 0)
    def _init():
        m_scr[...] = jnp.full_like(m_scr, -jnp.inf)
        l_scr[...] = jnp.zeros_like(l_scr)
        acc_scr[...] = jnp.zeros_like(acc_scr)

    tq = q_ref.shape[1]
    tk = k_ref.shape[1]
    inner = heads * dim_head

    # Head split happens in-register on lane-dense slabs; HBM never holds a
    # (B, H, N, Dh) array.  q was already scaled by 1/sqrt(Dh) via the weight.
    q = q_ref[0].reshape(tq, heads, dim_head).transpose(1, 0, 2)   # (H, tq, Dh) bf16
    k = k_ref[0].reshape(tk, heads, dim_head).transpose(1, 0, 2)   # (H, tk, Dh) bf16
    v = v_ref[0].reshape(tk, heads, dim_head).transpose(1, 0, 2)   # (H, tk, Dh) bf16

    # scores for all heads in one batched MXU einsum, f32 accumulation
    s = jnp.einsum('hqd,hkd->hqk', q, k,
                   preferred_element_type=jnp.float32)             # (H, tq, tk)

    # online (flash) softmax update, all statistics in f32
    m_prev = m_scr[...]                                            # (H, tq)
    m_new = jnp.maximum(m_prev, jnp.max(s, axis=-1))
    alpha = jnp.exp(m_prev - m_new)
    p = jnp.exp(s - m_new[:, :, None])                             # (H, tq, tk) f32
    l_scr[...] = alpha * l_scr[...] + jnp.sum(p, axis=-1)
    pv = jnp.einsum('hqk,hkd->hqd', p.astype(v.dtype), v,
                    preferred_element_type=jnp.float32)            # (H, tq, Dh)
    acc_scr[...] = alpha[:, :, None] * acc_scr[...] + pv
    m_scr[...] = m_new
    # dropout(p=0.0) is identity

    @pl.when(kv_idx == pl.num_programs(2) - 1)
    def _finalize():
        inv_l = pl.reciprocal(l_scr[...], approx=True)             # (H, tq)
        attn_out = acc_scr[...] * inv_l[:, :, None]                # (H, tq, Dh) f32
        # single lane-dense (tq, inner) slab -> one K=inner out-projection
        attn_out = attn_out.transpose(1, 0, 2).reshape(tq, inner)
        proj = jnp.dot(attn_out.astype(wo_ref.dtype), wo_ref[...],
                       preferred_element_type=jnp.float32)         # (tq, D)
        o_ref[0] = (proj + bo_ref[...]).astype(o_ref.dtype)


# ---------------------------------------------------------------------------
# Wrapper
# ---------------------------------------------------------------------------
def attention_forward(x, params, heads, *, mm_tile=256, q_tile=256, kv_tile=256):
    """x: (B, N, dim). params: w_qkv (dim, 3*inner), w_out (inner, dim),
    b_out (dim,). Weights stored as (in, out), i.e. W^T of nn.Linear."""
    B, N, D = x.shape
    w_qkv = params["w_qkv"]
    w_out = params["w_out"]
    b_out = params["b_out"]
    n3 = w_qkv.shape[1]
    inner = n3 // 3
    dim_head = inner // heads
    scale = dim_head ** (-0.5)

    # Weight preprocessing (would be done once at load time in a real model):
    # fold the softmax scale into the Q columns, cast MXU operands to bf16.
    col_scale = jnp.concatenate([jnp.full((inner,), scale, jnp.float32),
                                 jnp.ones((2 * inner,), jnp.float32)])
    w_qkv_b = (w_qkv * col_scale[None, :]).astype(jnp.bfloat16)
    w_out_b = w_out.astype(jnp.bfloat16)
    b_out2 = b_out.reshape(1, D).astype(jnp.float32)
    x2 = x.reshape(B * N, D).astype(jnp.bfloat16)

    # ---- Kernel A: QKV projection ------------------------------------------
    M = B * N
    tm = _tile(M, mm_tile)
    tn = _tile(n3, mm_tile)
    tk = _tile(D, mm_tile)

    qkv = pl.pallas_call(
        _qkv_matmul_kernel,
        out_shape=jax.ShapeDtypeStruct((M, n3), jnp.bfloat16),
        grid=(M // tm, n3 // tn, D // tk),
        in_specs=[
            pl.BlockSpec((tm, tk), lambda i, j, k: (i, k)),   # x
            pl.BlockSpec((tk, tn), lambda i, j, k: (k, j)),   # w_qkv
        ],
        out_specs=pl.BlockSpec((tm, tn), lambda i, j, k: (i, j)),
        scratch_shapes=[pltpu.VMEM((tm, tn), jnp.float32)],
        compiler_params=pltpu.CompilerParams(
            dimension_semantics=("parallel", "parallel", "arbitrary"),
            vmem_limit_bytes=_VMEM_LIMIT),
        cost_estimate=pl.CostEstimate(
            flops=int(2 * M * D * n3),
            transcendentals=0,
            bytes_accessed=int(2 * (M * D + D * n3 + M * n3))),
    )(x2, w_qkv_b)

    qkv3 = qkv.reshape(B, N, n3)   # lane-dense (B, N, 3*inner) in HBM

    # ---- Kernel B: flash attention + output projection ----------------------
    tq = _tile(N, q_tile)
    tkv = _tile(N, kv_tile)
    n_q = N // tq
    n_kv = N // tkv

    kern = functools.partial(_flash_attention_kernel,
                             heads=heads, dim_head=dim_head)

    flops_b = int(4 * B * heads * N * N * dim_head + 2 * B * N * inner * D)
    bytes_b = int(2 * B * N * inner * (1 + 2 * n_q) + 2 * inner * D
                  + 4 * D + 4 * B * N * D)

    out = pl.pallas_call(
        kern,
        out_shape=jax.ShapeDtypeStruct((B, N, D), jnp.float32),
        grid=(B, n_q, n_kv),
        in_specs=[
            # Q / K / V thirds of the same lane-dense qkv array, selected by
            # the last-dim block index (0, 1, 2) -> no split copies in HBM.
            pl.BlockSpec((1, tq, inner), lambda b, qi, ki: (b, qi, 0)),
            pl.BlockSpec((1, tkv, inner), lambda b, qi, ki: (b, ki, 1)),
            pl.BlockSpec((1, tkv, inner), lambda b, qi, ki: (b, ki, 2)),
            pl.BlockSpec((inner, D), lambda b, qi, ki: (0, 0)),   # w_out (resident)
            pl.BlockSpec((1, D), lambda b, qi, ki: (0, 0)),       # b_out (resident)
        ],
        out_specs=pl.BlockSpec((1, tq, D), lambda b, qi, ki: (b, qi, 0)),
        scratch_shapes=[
            pltpu.VMEM((heads, tq), jnp.float32),             # running max m
            pltpu.VMEM((heads, tq), jnp.float32),             # running denom l
            pltpu.VMEM((heads, tq, dim_head), jnp.float32),   # running acc
        ],
        compiler_params=pltpu.CompilerParams(
            dimension_semantics=("parallel", "parallel", "arbitrary"),
            vmem_limit_bytes=_VMEM_LIMIT),
        cost_estimate=pl.CostEstimate(
            flops=flops_b,
            transcendentals=int(B * heads * N * N),
            bytes_accessed=bytes_b),
    )(qkv3, qkv3, qkv3, w_out_b, b_out2)

    return out


# ---------------------------------------------------------------------------
# Pure-JAX reference (matches the PyTorch module) for a correctness check.
# ---------------------------------------------------------------------------
def attention_reference(x, params, heads):
    B, N, D = x.shape
    w_qkv, w_out, b_out = params["w_qkv"], params["w_out"], params["b_out"]
    inner = w_qkv.shape[1] // 3
    dim_head = inner // heads
    scale = dim_head ** (-0.5)

    qkv = x @ w_qkv
    q, k, v = jnp.split(qkv, 3, axis=-1)

    def split_heads(t):
        return t.reshape(B, N, heads, dim_head).transpose(0, 2, 1, 3)

    q, k, v = split_heads(q), split_heads(k), split_heads(v)
    dots = jnp.einsum('bhqd,bhkd->bhqk', q, k) * scale
    attn = jax.nn.softmax(dots, axis=-1)
    out = jnp.einsum('bhqk,bhkd->bhqd', attn, v)
    out = out.transpose(0, 2, 1, 3).reshape(B, N, inner)
    return out @ w_out + b_out[None, None, :]


def init_params(key, dim, heads, dim_head):
    inner = heads * dim_head
    k1, k2, k3 = jax.random.split(key, 3)
    w_qkv = jax.random.normal(k1, (dim, 3 * inner), jnp.float32) * (dim ** -0.5)
    w_out = jax.random.normal(k2, (inner, dim), jnp.float32) * (inner ** -0.5)
    b_out = jax.random.normal(k3, (dim,), jnp.float32) * 0.01
    return {"w_qkv": w_qkv, "w_out": w_out, "b_out": b_out}


if __name__ == "__main__":
    # Small-but-lane-dense shapes (all feature dims are multiples of 128 so
    # nothing is a masked partial-vreg access): dim=128, heads=4, dim_head=32.
    B, N, DIM, HEADS, DIM_HEAD = 2, 8, 128, 4, 32

    key = jax.random.PRNGKey(0)
    kx, kp = jax.random.split(key)
    x = jax.random.normal(kx, (B, N, DIM), jnp.float32)
    params = init_params(kp, DIM, HEADS, DIM_HEAD)

    out = attention_forward(x, params, HEADS)
    out = jax.block_until_ready(out)
    assert out.shape == (B, N, DIM)

    ref = attention_reference(x, params, HEADS)
    # bf16 MXU operands (f32 accumulation) + EUP approx reciprocal in the
    # softmax -> ~1% relative error vs. the f32 reference.
    assert jnp.allclose(out, ref, atol=5e-2, rtol=5e-2)

    print("KERNEL_OK")
</pallas_src>

<mosaic_0001>
module attributes {stable_mosaic.version = 11 : i64} {
  func.func @_qkv_matmul_kernel(%arg0: i32, %arg1: i32, %arg2: i32, %arg3: memref<16x128xbf16, #tpu.memory_space<vmem>>, %arg4: memref<128x384xbf16, #tpu.memory_space<vmem>>, %arg5: memref<16x384xbf16, #tpu.memory_space<vmem>>, %arg6: memref<16x384xf32, #tpu.memory_space<vmem>>) attributes {dimension_semantics = [#tpu.dimension_semantics<parallel>, #tpu.dimension_semantics<parallel>, #tpu.dimension_semantics<arbitrary>], iteration_bounds = array<i64: 1, 1, 1>, scalar_prefetch = 0 : i64, scratch_operands = 1 : i64, tpu.core_type = #tpu.core_type<tc>, window_params = [{transform_indices = @transform_0, window_bounds = array<i64: 16, 128>}, {transform_indices = @transform_1, window_bounds = array<i64: 128, 384>}, {transform_indices = @transform_2, window_bounds = array<i64: 16, 384>}]} {
    %c0_i32 = arith.constant 0 : i32
    %0 = arith.cmpi eq, %arg2, %c0_i32 : i32
    %1 = arith.extui %0 : i1 to i32
    %c0_i32_0 = arith.constant 0 : i32
    %2 = arith.cmpi ne, %1, %c0_i32_0 : i32
    scf.if %2 {
      %cst_10 = arith.constant 0.000000e+00 : f32
      %12 = vector.broadcast %cst_10 : f32 to vector<16x384xf32>
      %c0_11 = arith.constant 0 : index
      %c0_12 = arith.constant 0 : index
      %13 = vector.load %arg6[%c0_11, %c0_12] : memref<16x384xf32, #tpu.memory_space<vmem>>, vector<16x384xf32>
      tpu.vector_store %arg6[%c0_11, %c0_12], %12 {strides = array<i32>} : memref<16x384xf32, #tpu.memory_space<vmem>>, vector<16x384xf32>,
    } else {
    }
    %c0 = arith.constant 0 : index
    %c0_1 = arith.constant 0 : index
    %3 = vector.load %arg6[%c0, %c0_1] : memref<16x384xf32, #tpu.memory_space<vmem>>, vector<16x384xf32>
    %c0_2 = arith.constant 0 : index
    %c0_3 = arith.constant 0 : index
    %4 = vector.load %arg3[%c0_2, %c0_3] : memref<16x128xbf16, #tpu.memory_space<vmem>>, vector<16x128xbf16>
    %c0_4 = arith.constant 0 : index
    %c0_5 = arith.constant 0 : index
    %5 = vector.load %arg4[%c0_4, %c0_5] : memref<128x384xbf16, #tpu.memory_space<vmem>>, vector<128x384xbf16>
    %cst = arith.constant dense<0.000000e+00> : vector<16x384xf32>
    %6 = tpu.matmul %4, %5, %cst {dimension_numbers = #tpu.dot_dimension_numbers<[1], [0], [0], [1], [0, 0, 1, 1], [], []>} : vector<16x128xbf16>, vector<128x384xbf16>, vector<16x384xf32> -> vector<16x384xf32>
    %7 = arith.addf %3, %6 : vector<16x384xf32>
    %c0_6 = arith.constant 0 : index
    %c0_7 = arith.constant 0 : index
    %8 = vector.load %arg6[%c0_6, %c0_7] : memref<16x384xf32, #tpu.memory_space<vmem>>, vector<16x384xf32>
    tpu.vector_store %arg6[%c0_6, %c0_7], %7 {strides = array<i32>} : memref<16x384xf32, #tpu.memory_space<vmem>>, vector<16x384xf32>,
    %c0_i32_8 = arith.constant 0 : i32
    %9 = arith.cmpi eq, %arg2, %c0_i32_8 : i32
    %10 = arith.extui %9 : i1 to i32
    %c0_i32_9 = arith.constant 0 : i32
    %11 = arith.cmpi ne, %10, %c0_i32_9 : i32
    scf.if %11 {
      %c0_10 = arith.constant 0 : index
      %c0_11 = arith.constant 0 : index
      %12 = vector.load %arg6[%c0_10, %c0_11] : memref<16x384xf32, #tpu.memory_space<vmem>>, vector<16x384xf32>
      %13 = arith.truncf %12 : vector<16x384xf32> to vector<16x384xbf16>
      %c0_12 = arith.constant 0 : index
      %c0_13 = arith.constant 0 : index
      %14 = vector.load %arg5[%c0_12, %c0_13] : memref<16x384xbf16, #tpu.memory_space<vmem>>, vector<16x384xbf16>
      tpu.vector_store %arg5[%c0_12, %c0_13], %13 {strides = array<i32>} : memref<16x384xbf16, #tpu.memory_space<vmem>>, vector<16x384xbf16>,
    } else {
    }
    return
  }
  func.func @transform_0(%arg0: i32, %arg1: i32, %arg2: i32) -> (i32, i32) {
    %c0_i32 = arith.constant 0 : i32
    return %arg0, %arg2 : i32, i32
  }
  func.func @transform_1(%arg0: i32, %arg1: i32, %arg2: i32) -> (i32, i32) {
    %c0_i32 = arith.constant 0 : i32
    return %arg2, %arg1 : i32, i32
  }
  func.func @transform_2(%arg0: i32, %arg1: i32, %arg2: i32) -> (i32, i32) {
    %c0_i32 = arith.constant 0 : i32
    return %arg0, %arg1 : i32, i32
  }
}

</mosaic_0001>

<bundles_post_ra>
// kernel: tpu_custom_call.1
= control target key start
LH: loop header
LB: loop body
LE: loop exit
PB: predicated region body
PF: predicated region fallthrough
CT: control target
= control target key end

     0   :  { %7 = vsyncpa [#allocation4], 0  ;;  %s583_s0 = inlined_call_operand.hbm [shape: bf16[16,128], index: 0, kind: input, shape index: {}]   ;;  %s584_s1 = inlined_call_operand.hbm [shape: bf16[128,384], index: 1, kind: input, shape index: {}]   ;;  %s585_s2 = inlined_call_operand.hbm [shape: bf16[16,384], index: 2, kind: output, shape index: {}]  }
   0x1   :  { %8 = vsyncpa [#allocation7], 0 }
   0x2   :  { %9 = vsyncpa [#allocation5], 0  ;;  %s543_s9 = smov [#allocation3]  }
   0x3   :  { %s15_s10 = sshll.u32 %s543_s9, 4  ;;  %s16_s10 = int_to_ptr.vmem [resolvable:$true] %s15_s10 }
   0x4   :  { %s485_s11 = scalar_lea.vmem %s16_s10, 128  ;;  %p490_p1 = scmp.lt.s32.totalorder %s16_s10, %s16_s10 }
   0x5   :  { %p486_p0 = scmp.ne.s32.totalorder %s16_s10, %s485_s11  ;;  %p491_p2 = scmp.lt.s32.totalorder %s485_s11, %s485_s11 }
   0x7   :  { %p492_p3 = por %p491_p2, %p490_p1 }
   0x9   :  { %p493_p4 = pnand %p492_p3, %p486_p0 }
   0xb   :  { %496 = shalt.err (!%p493_p4)
}
   0xc   :  { %s544_s12 = smov 64   ;;  %s545_s13 = smov 4  }
   0xd   :  { %21 = dma.hbm_to_vmem [thread:$0]  %s583_s0, 128, %s16_s10, [#allocation4], %s544_s12, %s544_s12, %s545_s13  }
   0xe   :  { %s546_s16 = smov [#allocation6]  }
   0xf   :  { %s27_s17 = sshll.u32 %s546_s16, 4  ;;  %s28_s17 = int_to_ptr.vmem [resolvable:$true] %s27_s17 }
  0x10   :  { %s505_s18 = scalar_lea.vmem %s28_s17, 3072  ;;  %p510_p6 = scmp.lt.s32.totalorder %s28_s17, %s28_s17 }
  0x11   :  { %p506_p5 = scmp.ne.s32.totalorder %s28_s17, %s505_s18  ;;  %p511_p7 = scmp.lt.s32.totalorder %s505_s18, %s505_s18 }
  0x13   :  { %p512_p8 = por %p511_p7, %p510_p6 }
  0x15   :  { %p513_p9 = pnand %p512_p8, %p506_p5 }
  0x17   :  { %516 = shalt.err (!%p513_p9)
}
  0x18   :  { %s547_s19 = smov 192   ;;  %s548_s20 = smov 12  }
  0x19   :  { %33 = dma.hbm_to_vmem [thread:$0]  %s584_s1, 3072, %s28_s17, [#allocation7], %s547_s19, %s547_s19, %s548_s20  }
  0x1a   :  { %537 = dma.done.wait [#allocation4], 128  }
  0x1b   :  { %538 = vsyncadd [#allocation4], 4294967168 }
  0x1c   :  { %539 = dma.done.wait [#allocation7], 3072  }
  0x1d   :  { %540 = vsyncadd [#allocation7], 4294964224  ;;  %v549_v0 = vmov 0.0   ;;  %vm550_vm0 = vmmov 0   ;;  %v551_v1 = vmov 0   ;;  %v476_v26 = vld [vmem:[#allocation3] sm:$0xff]  }
  0x1e   :  { %414 = vmatprep.subr.bf16.mxu1 %v549_v0  ;;  %430 = vmatprep.mubr.msk.bf16.mxu1 %vm550_vm0, %v549_v0  ;;  %v444_v2 = vld [vmem:[#allocation6 + $0xac] ss:$12 sps:$4 sm:$0xff]   ;;  %v446_v3 = vld [vmem:[#allocation6 + $0xb0] ss:$12 sps:$4 sm:$0xff]   ;;  %v447_v4 = vld [vmem:[#allocation6 + $0xa8] ss:$12 sps:$4 sm:$0xff]  }
  0x1f   :  { %257 = vmatprep.mubr.bf16.mxu0 %v551_v1  ;;  %225 = vmatprep.subr.bf16.mxu0 %v444_v2  ;;  %v448_v5 = vld [vmem:[#allocation6 + $0x94] ss:$12 sps:$4 sm:$0xff]   ;;  %v450_v6 = vld [vmem:[#allocation6 + $0x98] ss:$12 sps:$4 sm:$0xff]   ;;  %v451_v7 = vld [vmem:[#allocation6 + $0x90] ss:$12 sps:$4 sm:$0xff]  }
  0x20   :  { %415 = vmatpush3.bf16.msra.mxu1 %v446_v3  ;;  %226 = vmatpush1.bf16.msra.mxu0 %v447_v4  ;;  %v452_v8 = vld [vmem:[#allocation6 + $0x7c] ss:$12 sps:$4 sm:$0xff]   ;;  %v454_v9 = vld [vmem:[#allocation6 + $0x80] ss:$12 sps:$4 sm:$0xff]   ;;  %v455_v10 = vld [vmem:[#allocation6 + $0x78] ss:$12 sps:$4 sm:$0xff]  }
  0x21   :  { %416 = vmatprep.subr.bf16.mxu1 %v549_v0  ;;  %227 = vmatprep.subr.bf16.mxu0 %v448_v5  ;;  %v456_v11 = vld [vmem:[#allocation6 + $0x64] ss:$12 sps:$4 sm:$0xff]   ;;  %v458_v12 = vld [vmem:[#allocation6 + $0x68] ss:$12 sps:$4 sm:$0xff]   ;;  %v459_v13 = vld [vmem:[#allocation6 + $0x60] ss:$12 sps:$4 sm:$0xff]  }
  0x22   :  { %v460_v14 = vld [vmem:[#allocation6 + $0x4c] ss:$12 sps:$4 sm:$0xff]   ;;  %v462_v15 = vld [vmem:[#allocation6 + $0x50] ss:$12 sps:$4 sm:$0xff]   ;;  %v463_v16 = vld [vmem:[#allocation6 + $0x48] ss:$12 sps:$4 sm:$0xff]  }
  0x23   :  { %v464_v17 = vld [vmem:[#allocation6 + $0x34] ss:$12 sps:$4 sm:$0xff]   ;;  %v466_v18 = vld [vmem:[#allocation6 + $0x38] ss:$12 sps:$4 sm:$0xff]   ;;  %v467_v19 = vld [vmem:[#allocation6 + $0x30] ss:$12 sps:$4 sm:$0xff]  }
  0x24   :  { %417 = vmatpush3.bf16.msra.mxu1 %v450_v6  ;;  %228 = vmatpush1.bf16.msra.mxu0 %v451_v7  ;;  %v468_v20 = vld [vmem:[#allocation6 + $0x1c] ss:$12 sps:$4 sm:$0xff]   ;;  %v470_v21 = vld [vmem:[#allocation6 + $0x20] ss:$12 sps:$4 sm:$0xff]   ;;  %v471_v22 = vld [vmem:[#allocation6 + $0x18] ss:$12 sps:$4 sm:$0xff]  }
  0x25   :  { %418 = vmatprep.subr.bf16.mxu1 %v549_v0  ;;  %229 = vmatprep.subr.bf16.mxu0 %v452_v8  ;;  %v472_v23 = vld [vmem:[#allocation6 + $0x4] ss:$12 sps:$4 sm:$0xff]   ;;  %v474_v24 = vld [vmem:[#allocation6 + $0x8] ss:$12 sps:$4 sm:$0xff]   ;;  %v475_v25 = vld [vmem:[#allocation6] ss:$12 sps:$4 sm:$0xff]  }
  0x26   :  { %s552_s0 = smov [#allocation8]  }
  0x27   :  { %s359_s1 = sshll.u32 %s552_s0, 4  ;;  %s360_s1 = int_to_ptr.vmem [resolvable:$true] %s359_s1 }
  0x28   :  { %419 = vmatpush3.bf16.msra.mxu1 %v454_v9  ;;  %230 = vmatpush1.bf16.msra.mxu0 %v455_v10  ;;  %s517_s23 = scalar_lea.vmem %s360_s1, 384  ;;  %p522_p11 = scmp.lt.s32.totalorder %s360_s1, %s360_s1 }
  0x29   :  { %420 = vmatprep.subr.bf16.mxu1 %v549_v0  ;;  %231 = vmatprep.subr.bf16.mxu0 %v456_v11  ;;  %p518_p10 = scmp.ne.s32.totalorder %s360_s1, %s517_s23  ;;  %p523_p12 = scmp.lt.s32.totalorder %s517_s23, %s517_s23 }
  0x2b   :  { %p524_p13 = por %p523_p12, %p522_p11 }
  0x2c   :  { %421 = vmatpush3.bf16.msra.mxu1 %v458_v12  ;;  %232 = vmatpush1.bf16.msra.mxu0 %v459_v13 }
  0x2d   :  { %422 = vmatprep.subr.bf16.mxu1 %v549_v0  ;;  %233 = vmatprep.subr.bf16.mxu0 %v460_v14  ;;  %p525_p0 = pnand %p524_p13, %p518_p10 }
  0x30   :  { %423 = vmatpush3.bf16.msra.mxu1 %v462_v15  ;;  %234 = vmatpush1.bf16.msra.mxu0 %v463_v16 }
  0x31   :  { %424 = vmatprep.subr.bf16.mxu1 %v549_v0  ;;  %235 = vmatprep.subr.bf16.mxu0 %v464_v17 }
  0x34   :  { %425 = vmatpush3.bf16.msra.mxu1 %v466_v18  ;;  %236 = vmatpush1.bf16.msra.mxu0 %v467_v19 }
  0x35   :  { %426 = vmatprep.subr.bf16.mxu1 %v549_v0  ;;  %237 = vmatprep.subr.bf16.mxu0 %v468_v20 }
  0x38   :  { %427 = vmatpush3.bf16.msra.mxu1 %v470_v21  ;;  %238 = vmatpush1.bf16.msra.mxu0 %v471_v22 }
  0x39   :  { %428 = vmatprep.subr.bf16.mxu1 %v549_v0  ;;  %239 = vmatprep.subr.bf16.mxu0 %v472_v23 }
  0x3c   :  { %429 = vmatpush3.bf16.msra.mxu1 %v474_v24  ;;  %240 = vmatpush1.bf16.msra.mxu0 %v475_v25 }
  0x3f   :  { %431 = vmatmul.mubr.bf16.vlgmr.msra.gmra.mxu1 %v476_v26  ;;  %258 = vmatmul.mubr.bf16.vlgmr.msra.gmra.mxu0 %v476_v26 }
  0xff   :  { %v302_v27 = vpop.f32.mrf.mxu1  ;;  %v259_v29 = vpop.f32.mrf.mxu0 }
 0x100   :  { %v402_v28 = vpack.c.bf16 %v302_v27, %v302_v27 }
 0x101   :  { %v432_v30 = vpop.f32.mrf.mxu1  ;;  %v261_v31 = vpop.f32.mrf.mxu0 }
 0x102   :  { %351 = vst [vmem:[#allocation8 + $0x8] sm:$0xf] %v402_v28  ;;  %v401_v32 = vpack.c.bf16 %v261_v31, %v259_v29 }
 0x103   :  { %v305_v33 = vpop.f32.mrf.mxu1  ;;  %v263_v35 = vpop.f32.mrf.mxu0 }
 0x104   :  { %v404_v34 = vpack.c.bf16 %v305_v33, %v305_v33  ;;  %350 = vst [vmem:[#allocation8] sm:$0xff] %v401_v32 }
 0x105   :  { %v433_v36 = vpop.f32.mrf.mxu1  ;;  %v265_v37 = vpop.f32.mrf.mxu0 }
 0x106   :  { %353 = vst [vmem:[#allocation8 + $0x14] sm:$0xf] %v404_v34  ;;  %v403_v38 = vpack.c.bf16 %v265_v37, %v263_v35 }
 0x108   :  { %352 = vst [vmem:[#allocation8 + $0xc] sm:$0xff] %v403_v38 }
 0x109   :  { %528 = shalt.err (!%p525_p0)
}
 0x10a   :  { %365 = dma.vmem_to_hbm [thread:$0]  %s360_s1, 384, %s585_s2, [#allocation5], %s547_s19, %s547_s19, %s548_s20  }
 0x10b   :  { %541 = dma.done.wait [#allocation5], 384  }
 0x10c   :  { %542 = vsyncadd [#allocation5], 4294966912 }
 0x10d   :  { %369 = vsyncpa [#allocation4], 1 }
 0x10e   :  { %370 = vsyncpa [#allocation7], 1 }
 0x10f   :  { %371 = vsyncpa [#allocation5], 1 }

</bundles_post_ra>
